<compile_context>
chip_gen: v7x
topology: tpu7x:2x2x1
jax: 0.10.0
libtpu: 0.0.40
codegen_flags: <defaults>
</compile_context>

<pallas_src>
import functools

import jax
import jax.numpy as jnp
from jax.experimental import pallas as pl
from jax.experimental.pallas import tpu as pltpu

EPS = 1e-5  # nn.LayerNorm default eps


def _layernorm(v, g, b):
    # f32 statistics regardless of activation dtype.
    v = v.astype(jnp.float32)
    mu = jnp.mean(v, axis=-1, keepdims=True)
    var = jnp.mean((v - mu) ** 2, axis=-1, keepdims=True)
    return (v - mu) * jax.lax.rsqrt(var + EPS) * g + b


def _vmem_limit(bytes_needed):
    # Estimated working set (double-buffered operands + single-buffered
    # intermediates) plus headroom, clamped to v7x's 64 MiB per-TC VMEM.
    return int(min(max(int(bytes_needed) + (8 << 20), 32 << 20), 64 << 20))


def _const_spec(a):
    nd = a.ndim
    return pl.BlockSpec(a.shape, lambda b, _nd=nd: (0,) * _nd)


# ----------------------------------------------------------------------------
# Fused transformer Block kernel:
#   LN1 -> fused QKV -> multi-head causal attention -> proj_sa -> +residual
#   LN2 -> FeedForward (Linear 4x + ReLU) -> proj_ffwd -> +residual
# ----------------------------------------------------------------------------
def _block_kernel(x_ref, ln1g_ref, ln1b_ref, wqkv_ref, wps_ref, bps_ref,
                  ln2g_ref, ln2b_ref, wff_ref, bff_ref, wpf_ref, bpf_ref,
                  o_ref, *, n_head):
    x = x_ref[0].astype(jnp.float32)                 # (T, C) residual in f32
    T, C = x.shape
    H = n_head
    hs = C // H
    scale = C ** -0.5    # NOTE: reference scales by the full embed dim, not hs

    # ---- LN1 (f32 stats) -> bf16 for the MXU --------------------------------
    xn = _layernorm(x, ln1g_ref[...], ln1b_ref[...]).astype(jnp.bfloat16)

    # ---- fused QKV: one lane-dense matmul, N = 3C ----------------------------
    qkv = jnp.dot(xn, wqkv_ref[...], preferred_element_type=jnp.float32)
    q = (qkv[:, :C] * scale).astype(jnp.bfloat16)    # fold scale into q
    k = qkv[:, C:2 * C].astype(jnp.bfloat16)
    v = qkv[:, 2 * C:].astype(jnp.bfloat16)

    # Head-major stacks (H, T, hs) via static lane slices (copies only the
    # (T, C)-sized q/k/v, not an (H, T, C) broadcast).
    qh = jnp.stack([q[:, h * hs:(h + 1) * hs] for h in range(H)], axis=0)
    kh = jnp.stack([k[:, h * hs:(h + 1) * hs] for h in range(H)], axis=0)
    vh = jnp.stack([v[:, h * hs:(h + 1) * hs] for h in range(H)], axis=0)

    # ---- causal scores + softmax (f32 stats) ---------------------------------
    # (H,T,hs) x (H,T,hs) contracting hs -> (H,T,T); no explicit k.T transpose.
    scores = jax.lax.dot_general(qh, kh, (((2,), (2,)), ((0,), (0,))),
                                 preferred_element_type=jnp.float32)
    row = jax.lax.broadcasted_iota(jnp.int32, (T, T), 0)
    col = jax.lax.broadcasted_iota(jnp.int32, (T, T), 1)
    scores = jnp.where((row >= col)[None], scores, jnp.float32(-1e30))
    m = jnp.max(scores, axis=-1, keepdims=True)
    e = jnp.exp(scores - m)
    denom = jnp.sum(e, axis=-1, keepdims=True)
    p = (e * pl.reciprocal(denom, approx=True)).astype(jnp.bfloat16)

    # (H,T,T) x (H,T,hs) -> (H,T,hs)
    attn = jax.lax.dot_general(p, vh, (((2,), (1,)), ((0,), (0,))),
                               preferred_element_type=jnp.float32)

    # concat(heads) along lanes -> (T, C), then one (T,C)@(C,C) projection.
    cat = jnp.concatenate([attn[h] for h in range(H)],
                          axis=-1).astype(jnp.bfloat16)
    x1 = (jnp.dot(cat, wps_ref[...], preferred_element_type=jnp.float32)
          + bps_ref[...] + x)                        # residual 1 (dropout=id)

    # ---- LN2 + FeedForward + residual ----------------------------------------
    xn2 = _layernorm(x1, ln2g_ref[...], ln2b_ref[...]).astype(jnp.bfloat16)
    hff = jnp.dot(xn2, wff_ref[...],
                  preferred_element_type=jnp.float32) + bff_ref[...]
    hff = jnp.maximum(hff, 0.0).astype(jnp.bfloat16)
    x2 = (jnp.dot(hff, wpf_ref[...], preferred_element_type=jnp.float32)
          + bpf_ref[...] + x1)                       # residual 2 (dropout=id)

    o_ref[0] = x2.astype(o_ref.dtype)


def transformer_block(x, p):
    B, T, C = x.shape
    H = p["n_head"]
    hs = C // H

    weights = [p["ln1_g"], p["ln1_b"], p["w_qkv"], p["w_proj_sa"],
               p["b_proj_sa"], p["ln2_g"], p["ln2_b"], p["w_ff"], p["b_ff"],
               p["w_proj_ff"], p["b_proj_ff"]]
    in_specs = ([pl.BlockSpec((1, T, C), lambda b: (b, 0, 0))]
                + [_const_spec(a) for a in weights])

    # VMEM estimate: double-buffered operand blocks + kernel intermediates.
    w_bytes = sum(a.size * a.dtype.itemsize for a in weights)
    io_bytes = 2 * T * C * x.dtype.itemsize
    inter_bytes = (4 * T * 3 * C                 # qkv f32
                   + 2 * 6 * T * C               # q/k/v + head stacks (bf16)
                   + 4 * 2 * H * T * T           # scores, e (f32)
                   + 2 * H * T * T               # p (bf16)
                   + 4 * H * T * hs + 2 * T * C  # attn f32, cat bf16
                   + 4 * T * 4 * C + 2 * T * 4 * C   # hff f32 + bf16
                   + 4 * 4 * T * C)              # x/xn/x1/x2 f32 copies
    need = 2 * (w_bytes + io_bytes) + inter_bytes

    # Weight index_maps are constant, so their blocks stay resident across the
    # batch grid (single DMA each).
    return pl.pallas_call(
        functools.partial(_block_kernel, n_head=H),
        out_shape=jax.ShapeDtypeStruct((B, T, C), x.dtype),
        grid=(B,),
        in_specs=in_specs,
        out_specs=pl.BlockSpec((1, T, C), lambda b: (b, 0, 0)),
        compiler_params=pltpu.CompilerParams(
            dimension_semantics=("parallel",),
            vmem_limit_bytes=_vmem_limit(need)),
    )(x, *weights)


# ----------------------------------------------------------------------------
# Final LayerNorm (computed exactly once) + vocab-tiled lm_head.
# The (C, V) weight is streamed from HBM exactly once: activations are
# flattened to (B*T, C) and kept resident (constant index map) while the grid
# walks vocab tiles.
# ----------------------------------------------------------------------------
def _lnf_kernel(x_ref, g_ref, b_ref, o_ref):
    o_ref[0] = _layernorm(x_ref[0], g_ref[...], b_ref[...]).astype(o_ref.dtype)


def _lm_head_kernel(xn_ref, w_ref, b_ref, o_ref):
    logits = jnp.dot(xn_ref[...], w_ref[...],
                     preferred_element_type=jnp.float32) + b_ref[...]
    o_ref[...] = logits.astype(o_ref.dtype)


def _pick_tile_v(V):
    if V % 128 == 0:
        for tv in (1024, 512, 256, 128):
            if V % tv == 0:
                return tv
    # TODO(synk): for large ragged V, pre-pad the lm_head weight once at init
    # instead of using a single full-extent tile.
    return V


def final_head(x, params):
    B, T, C = x.shape
    w = params["w_lm"]                     # (C, V) bf16
    bias = params["b_lm"]                  # (1, V) f32
    V = w.shape[1]

    # 1) Final LayerNorm, once per row (not once per vocab tile).
    xn = pl.pallas_call(
        _lnf_kernel,
        out_shape=jax.ShapeDtypeStruct((B, T, C), jnp.bfloat16),
        grid=(B,),
        in_specs=[pl.BlockSpec((1, T, C), lambda b: (b, 0, 0)),
                  _const_spec(params["lnf_g"]),
                  _const_spec(params["lnf_b"])],
        out_specs=pl.BlockSpec((1, T, C), lambda b: (b, 0, 0)),
        compiler_params=pltpu.CompilerParams(
            dimension_semantics=("parallel",)),
    )(x, params["lnf_g"], params["lnf_b"])

    # 2) lm_head: rows resident, vocab tiled; W streamed exactly once.
    xn2d = xn.reshape(B * T, C)
    tile_v = _pick_tile_v(V)
    nv = V // tile_v

    need = 2 * ((B * T) * C * 2 + C * tile_v * 2 + tile_v * 4
                + (B * T) * tile_v * 4) + (B * T) * tile_v * 4

    logits = pl.pallas_call(
        _lm_head_kernel,
        out_shape=jax.ShapeDtypeStruct((B * T, V), jnp.float32),
        grid=(nv,),
        in_specs=[
            pl.BlockSpec((B * T, C), lambda v: (0, 0)),      # resident rows
            pl.BlockSpec((C, tile_v), lambda v: (0, v)),     # streamed once
            pl.BlockSpec((1, tile_v), lambda v: (0, v)),
        ],
        out_specs=pl.BlockSpec((B * T, tile_v), lambda v: (0, v)),
        compiler_params=pltpu.CompilerParams(
            dimension_semantics=("parallel",),
            vmem_limit_bytes=_vmem_limit(need)),
    )(xn2d, w, bias)
    return logits.reshape(B, T, V)


# ----------------------------------------------------------------------------
# Parameter init (deterministic, synthetic) + full forward
# ----------------------------------------------------------------------------
def init_params(key, n_embed, vocab_size, block_size, n_head, n_blocks):
    C = n_embed
    keys = iter(jax.random.split(key, 8 + 8 * n_blocks))

    def w(shape, scale=0.02, dtype=jnp.bfloat16):
        return (scale * jax.random.normal(next(keys), shape,
                                          jnp.float32)).astype(dtype)

    params = {
        "n_head": n_head,
        "tok_emb": w((vocab_size, C), 1.0, jnp.float32),
        "pos_emb": w((block_size, C), 1.0, jnp.float32),
        "lnf_g": jnp.ones((1, C), jnp.float32),
        "lnf_b": jnp.zeros((1, C), jnp.float32),
        "w_lm": w((C, vocab_size)),
        "b_lm": jnp.zeros((1, vocab_size), jnp.float32),
        "blocks": [],
    }
    for _ in range(n_blocks):
        params["blocks"].append({
            "n_head": n_head,
            "ln1_g": jnp.ones((1, C), jnp.float32),
            "ln1_b": jnp.zeros((1, C), jnp.float32),
            # Fused QKV weight: columns [0:C]=Q, [C:2C]=K, [2C:3C]=V, each
            # head-major (head h occupies cols h*hs:(h+1)*hs of its section),
            # matching torch's per-head bias-free Linear layers.
            "w_qkv": w((C, 3 * C)),
            # Standard-layout output projection (rows ordered head-major),
            # i.e. concat(heads) @ W + b.
            "w_proj_sa": w((C, C)),
            "b_proj_sa": jnp.zeros((1, C), jnp.float32),
            "ln2_g": jnp.ones((1, C), jnp.float32),
            "ln2_b": jnp.zeros((1, C), jnp.float32),
            "w_ff": w((C, 4 * C)),
            "b_ff": jnp.zeros((1, 4 * C), jnp.float32),
            "w_proj_ff": w((4 * C, C)),
            "b_proj_ff": jnp.zeros((1, C), jnp.float32),
        })
    return params


def gpt_forward(params, idx):
    # Embedding gathers are glue (plain JAX); the hot path lives in kernels.
    B, T = idx.shape
    tok = params["tok_emb"][idx]                    # (B, T, C) f32
    pos = params["pos_emb"][:T]                     # (T, C) f32
    x = (tok + pos[None, :, :]).astype(jnp.bfloat16)
    for p in params["blocks"]:
        x = transformer_block(x, p)
    logits = final_head(x, params)
    return logits                                   # (B, T, vocab) f32


if __name__ == "__main__":
    n_embed = 32
    vocab_size = 64
    block_size = 8
    n_head = 4
    n_transformer_blocks = 2
    B, T = 2, 8

    key = jax.random.PRNGKey(0)
    k_params, k_idx = jax.random.split(key)
    params = init_params(k_params, n_embed, vocab_size, block_size,
                         n_head, n_transformer_blocks)
    idx = jax.random.randint(k_idx, (B, T), 0, vocab_size, dtype=jnp.int32)

    logits = gpt_forward(params, idx)
    logits = jax.block_until_ready(logits)
    assert logits.shape == (B, T, vocab_size)
    assert bool(jnp.all(jnp.isfinite(logits)))
    print("KERNEL_OK")
</pallas_src>

<mosaic_0001>
module attributes {stable_mosaic.version = 11 : i64} {
  func.func @_block_kernel(%arg0: i32, %arg1: memref<1x8x32xbf16, #tpu.memory_space<vmem>>, %arg2: memref<1x32xf32, #tpu.memory_space<vmem>>, %arg3: memref<1x32xf32, #tpu.memory_space<vmem>>, %arg4: memref<32x96xbf16, #tpu.memory_space<vmem>>, %arg5: memref<32x32xbf16, #tpu.memory_space<vmem>>, %arg6: memref<1x32xf32, #tpu.memory_space<vmem>>, %arg7: memref<1x32xf32, #tpu.memory_space<vmem>>, %arg8: memref<1x32xf32, #tpu.memory_space<vmem>>, %arg9: memref<32x128xbf16, #tpu.memory_space<vmem>>, %arg10: memref<1x128xf32, #tpu.memory_space<vmem>>, %arg11: memref<128x32xbf16, #tpu.memory_space<vmem>>, %arg12: memref<1x32xf32, #tpu.memory_space<vmem>>, %arg13: memref<1x8x32xbf16, #tpu.memory_space<vmem>>) attributes {dimension_semantics = [#tpu.dimension_semantics<parallel>], iteration_bounds = array<i64: 2>, scalar_prefetch = 0 : i64, scratch_operands = 0 : i64, tpu.core_type = #tpu.core_type<tc>, window_params = [{transform_indices = @transform_0, window_bounds = array<i64: 1, 8, 32>}, {pipeline_mode = #tpu.pipeline_mode<synchronous>, transform_indices = @transform_1, window_bounds = array<i64: 1, 32>}, {pipeline_mode = #tpu.pipeline_mode<synchronous>, transform_indices = @transform_2, window_bounds = array<i64: 1, 32>}, {pipeline_mode = #tpu.pipeline_mode<synchronous>, transform_indices = @transform_3, window_bounds = array<i64: 32, 96>}, {pipeline_mode = #tpu.pipeline_mode<synchronous>, transform_indices = @transform_4, window_bounds = array<i64: 32, 32>}, {pipeline_mode = #tpu.pipeline_mode<synchronous>, transform_indices = @transform_5, window_bounds = array<i64: 1, 32>}, {pipeline_mode = #tpu.pipeline_mode<synchronous>, transform_indices = @transform_6, window_bounds = array<i64: 1, 32>}, {pipeline_mode = #tpu.pipeline_mode<synchronous>, transform_indices = @transform_7, window_bounds = array<i64: 1, 32>}, {pipeline_mode = #tpu.pipeline_mode<synchronous>, transform_indices = @transform_8, window_bounds = array<i64: 32, 128>}, {pipeline_mode = #tpu.pipeline_mode<synchronous>, transform_indices = @transform_9, window_bounds = array<i64: 1, 128>}, {pipeline_mode = #tpu.pipeline_mode<synchronous>, transform_indices = @transform_10, window_bounds = array<i64: 128, 32>}, {pipeline_mode = #tpu.pipeline_mode<synchronous>, transform_indices = @transform_11, window_bounds = array<i64: 1, 32>}, {transform_indices = @transform_12, window_bounds = array<i64: 1, 8, 32>}]} {
    %c0 = arith.constant 0 : index
    %c0_0 = arith.constant 0 : index
    %c0_1 = arith.constant 0 : index
    %0 = vector.load %arg1[%c0, %c0_0, %c0_1] : memref<1x8x32xbf16, #tpu.memory_space<vmem>>, vector<1x8x32xbf16>
    %1 = vector.shape_cast %0 : vector<1x8x32xbf16> to vector<8x32xbf16>
    %2 = arith.extf %1 : vector<8x32xbf16> to vector<8x32xf32>
    %c0_2 = arith.constant 0 : index
    %c0_3 = arith.constant 0 : index
    %3 = vector.load %arg2[%c0_2, %c0_3] : memref<1x32xf32, #tpu.memory_space<vmem>>, vector<1x32xf32>
    %c0_4 = arith.constant 0 : index
    %c0_5 = arith.constant 0 : index
    %4 = vector.load %arg3[%c0_4, %c0_5] : memref<1x32xf32, #tpu.memory_space<vmem>>, vector<1x32xf32>
    %cst = arith.constant dense<0.000000e+00> : vector<8xf32>
    %5 = vector.multi_reduction <add>, %2, %cst [1] : vector<8x32xf32> to vector<8xf32>
    %6 = vector.shape_cast %5 : vector<8xf32> to vector<8x1xf32>
    %cst_6 = arith.constant 3.200000e+01 : f32
    %7 = vector.broadcast %cst_6 : f32 to vector<8x1xf32>
    %8 = arith.divf %6, %7 : vector<8x1xf32>
    %9 = vector.broadcast %8 : vector<8x1xf32> to vector<8x32xf32>
    %10 = arith.subf %2, %9 : vector<8x32xf32>
    %11 = arith.mulf %10, %10 : vector<8x32xf32>
    %cst_7 = arith.constant dense<0.000000e+00> : vector<8xf32>
    %12 = vector.multi_reduction <add>, %11, %cst_7 [1] : vector<8x32xf32> to vector<8xf32>
    %13 = vector.shape_cast %12 : vector<8xf32> to vector<8x1xf32>
    %cst_8 = arith.constant 3.200000e+01 : f32
    %14 = vector.broadcast %cst_8 : f32 to vector<8x1xf32>
    %15 = arith.divf %13, %14 : vector<8x1xf32>
    %16 = vector.broadcast %8 : vector<8x1xf32> to vector<8x32xf32>
    %17 = arith.subf %2, %16 : vector<8x32xf32>
    %cst_9 = arith.constant 9.99999974E-6 : f32
    %18 = vector.broadcast %cst_9 : f32 to vector<8x1xf32>
    %19 = arith.addf %15, %18 : vector<8x1xf32>
    %20 = math.rsqrt %19 : vector<8x1xf32>
    %21 = vector.broadcast %20 : vector<8x1xf32> to vector<8x32xf32>
    %22 = arith.mulf %17, %21 : vector<8x32xf32>
    %23 = vector.broadcast %3 : vector<1x32xf32> to vector<8x32xf32>
    %24 = arith.mulf %22, %23 : vector<8x32xf32>
    %25 = vector.broadcast %4 : vector<1x32xf32> to vector<8x32xf32>
    %26 = arith.addf %24, %25 : vector<8x32xf32>
    %27 = arith.truncf %26 : vector<8x32xf32> to vector<8x32xbf16>
    %c0_10 = arith.constant 0 : index
    %c0_11 = arith.constant 0 : index
    %28 = vector.load %arg4[%c0_10, %c0_11] : memref<32x96xbf16, #tpu.memory_space<vmem>>, vector<32x96xbf16>
    %cst_12 = arith.constant dense<0.000000e+00> : vector<8x96xf32>
    %29 = tpu.matmul %27, %28, %cst_12 {dimension_numbers = #tpu.dot_dimension_numbers<[1], [0], [0], [1], [0, 0, 1, 1], [], []>} : vector<8x32xbf16>, vector<32x96xbf16>, vector<8x96xf32> -> vector<8x96xf32>
    %30 = vector.extract_strided_slice %29 {offsets = [0, 0], sizes = [8, 32], strides = [1, 1]} : vector<8x96xf32> to vector<8x32xf32>
    %cst_13 = arith.constant 0.176776692 : f32
    %31 = vector.broadcast %cst_13 : f32 to vector<8x32xf32>
    %32 = arith.mulf %30, %31 : vector<8x32xf32>
    %33 = arith.truncf %32 : vector<8x32xf32> to vector<8x32xbf16>
    %34 = vector.extract_strided_slice %29 {offsets = [0, 32], sizes = [8, 32], strides = [1, 1]} : vector<8x96xf32> to vector<8x32xf32>
    %35 = arith.truncf %34 : vector<8x32xf32> to vector<8x32xbf16>
    %36 = vector.extract_strided_slice %29 {offsets = [0, 64], sizes = [8, 32], strides = [1, 1]} : vector<8x96xf32> to vector<8x32xf32>
    %37 = arith.truncf %36 : vector<8x32xf32> to vector<8x32xbf16>
    %38 = vector.extract_strided_slice %33 {offsets = [0, 0], sizes = [8, 8], strides = [1, 1]} : vector<8x32xbf16> to vector<8x8xbf16>
    %39 = vector.extract_strided_slice %33 {offsets = [0, 8], sizes = [8, 8], strides = [1, 1]} : vector<8x32xbf16> to vector<8x8xbf16>
    %40 = vector.extract_strided_slice %33 {offsets = [0, 16], sizes = [8, 8], strides = [1, 1]} : vector<8x32xbf16> to vector<8x8xbf16>
    %41 = vector.extract_strided_slice %33 {offsets = [0, 24], sizes = [8, 8], strides = [1, 1]} : vector<8x32xbf16> to vector<8x8xbf16>
    %42 = vector.shape_cast %38 : vector<8x8xbf16> to vector<1x8x8xbf16>
    %43 = vector.shape_cast %39 : vector<8x8xbf16> to vector<1x8x8xbf16>
    %44 = vector.shape_cast %40 : vector<8x8xbf16> to vector<1x8x8xbf16>
    %45 = vector.shape_cast %41 : vector<8x8xbf16> to vector<1x8x8xbf16>
    %46 = tpu.concatenate %42, %43, %44, %45 in 0 : vector<1x8x8xbf16>, vector<1x8x8xbf16>, vector<1x8x8xbf16>, vector<1x8x8xbf16> -> vector<4x8x8xbf16>
    %47 = vector.extract_strided_slice %35 {offsets = [0, 0], sizes = [8, 8], strides = [1, 1]} : vector<8x32xbf16> to vector<8x8xbf16>
    %48 = vector.extract_strided_slice %35 {offsets = [0, 8], sizes = [8, 8], strides = [1, 1]} : vector<8x32xbf16> to vector<8x8xbf16>
    %49 = vector.extract_strided_slice %35 {offsets = [0, 16], sizes = [8, 8], strides = [1, 1]} : vector<8x32xbf16> to vector<8x8xbf16>
    %50 = vector.extract_strided_slice %35 {offsets = [0, 24], sizes = [8, 8], strides = [1, 1]} : vector<8x32xbf16> to vector<8x8xbf16>
    %51 = vector.shape_cast %47 : vector<8x8xbf16> to vector<1x8x8xbf16>
    %52 = vector.shape_cast %48 : vector<8x8xbf16> to vector<1x8x8xbf16>
    %53 = vector.shape_cast %49 : vector<8x8xbf16> to vector<1x8x8xbf16>
    %54 = vector.shape_cast %50 : vector<8x8xbf16> to vector<1x8x8xbf16>
    %55 = tpu.concatenate %51, %52, %53, %54 in 0 : vector<1x8x8xbf16>, vector<1x8x8xbf16>, vector<1x8x8xbf16>, vector<1x8x8xbf16> -> vector<4x8x8xbf16>
    %56 = vector.extract_strided_slice %37 {offsets = [0, 0], sizes = [8, 8], strides = [1, 1]} : vector<8x32xbf16> to vector<8x8xbf16>
    %57 = vector.extract_strided_slice %37 {offsets = [0, 8], sizes = [8, 8], strides = [1, 1]} : vector<8x32xbf16> to vector<8x8xbf16>
    %58 = vector.extract_strided_slice %37 {offsets = [0, 16], sizes = [8, 8], strides = [1, 1]} : vector<8x32xbf16> to vector<8x8xbf16>
    %59 = vector.extract_strided_slice %37 {offsets = [0, 24], sizes = [8, 8], strides = [1, 1]} : vector<8x32xbf16> to vector<8x8xbf16>
    %60 = vector.shape_cast %56 : vector<8x8xbf16> to vector<1x8x8xbf16>
    %61 = vector.shape_cast %57 : vector<8x8xbf16> to vector<1x8x8xbf16>
    %62 = vector.shape_cast %58 : vector<8x8xbf16> to vector<1x8x8xbf16>
    %63 = vector.shape_cast %59 : vector<8x8xbf16> to vector<1x8x8xbf16>
    %64 = tpu.concatenate %60, %61, %62, %63 in 0 : vector<1x8x8xbf16>, vector<1x8x8xbf16>, vector<1x8x8xbf16>, vector<1x8x8xbf16> -> vector<4x8x8xbf16>
    %cst_14 = arith.constant dense<0.000000e+00> : vector<4x8x8xf32>
    %65 = tpu.matmul %46, %55, %cst_14 {dimension_numbers = #tpu.dot_dimension_numbers<[2], [2], [1], [1], [0, 0, 0, 1, 1, 1], [0], [0]>} : vector<4x8x8xbf16>, vector<4x8x8xbf16>, vector<4x8x8xf32> -> vector<4x8x8xf32>
    %66 = tpu.iota {dimensions = array<i32: 0>} : vector<8x8xi32>
    %67 = tpu.iota {dimensions = array<i32: 1>} : vector<8x8xi32>
    %68 = arith.cmpi sge, %66, %67 : vector<8x8xi32>
    %69 = vector.shape_cast %68 : vector<8x8xi1> to vector<1x8x8xi1>
    %cst_15 = arith.constant -1.000000e+30 : f32
    %70 = vector.shape_cast %69 : vector<1x8x8xi1> to vector<1x8x8xi1>
    %71 = vector.broadcast %70 : vector<1x8x8xi1> to vector<4x8x8xi1>
    %72 = vector.broadcast %cst_15 : f32 to vector<4x8x8xf32>
    %73 = arith.select %71, %65, %72 : vector<4x8x8xi1>, vector<4x8x8xf32>
    %cst_16 = arith.constant dense<0xFF800000> : vector<4x8xf32>
    %74 = vector.multi_reduction <maximumf>, %73, %cst_16 [2] : vector<4x8x8xf32> to vector<4x8xf32>
    %75 = vector.shape_cast %74 : vector<4x8xf32> to vector<4x8x1xf32>
    %76 = vector.broadcast %75 : vector<4x8x1xf32> to vector<4x8x8xf32>
    %77 = arith.subf %73, %76 : vector<4x8x8xf32>
    %78 = math.exp %77 : vector<4x8x8xf32>
    %cst_17 = arith.constant dense<0.000000e+00> : vector<4x8xf32>
    %79 = vector.multi_reduction <add>, %78, %cst_17 [2] : vector<4x8x8xf32> to vector<4x8xf32>
    %80 = vector.shape_cast %79 : vector<4x8xf32> to vector<4x8x1xf32>
    %81 = tpu.reciprocal %80 {approx = true} : vector<4x8x1xf32> -> vector<4x8x1xf32>
    %82 = vector.broadcast %81 : vector<4x8x1xf32> to vector<4x8x8xf32>
    %83 = arith.mulf %78, %82 : vector<4x8x8xf32>
    %84 = arith.truncf %83 : vector<4x8x8xf32> to vector<4x8x8xbf16>
    %cst_18 = arith.constant dense<0.000000e+00> : vector<4x8x8xf32>
    %85 = tpu.matmul %84, %64, %cst_18 {dimension_numbers = #tpu.dot_dimension_numbers<[2], [1], [1], [2], [0, 0, 0, 1, 1, 2], [0], [0]>} : vector<4x8x8xbf16>, vector<4x8x8xbf16>, vector<4x8x8xf32> -> vector<4x8x8xf32>
    %86 = vector.extract_strided_slice %85 {offsets = [0, 0, 0], sizes = [1, 8, 8], strides = [1, 1, 1]} : vector<4x8x8xf32> to vector<1x8x8xf32>
    %87 = vector.shape_cast %86 : vector<1x8x8xf32> to vector<8x8xf32>
    %88 = vector.extract_strided_slice %85 {offsets = [1, 0, 0], sizes = [1, 8, 8], strides = [1, 1, 1]} : vector<4x8x8xf32> to vector<1x8x8xf32>
    %89 = vector.shape_cast %88 : vector<1x8x8xf32> to vector<8x8xf32>
    %90 = vector.extract_strided_slice %85 {offsets = [2, 0, 0], sizes = [1, 8, 8], strides = [1, 1, 1]} : vector<4x8x8xf32> to vector<1x8x8xf32>
    %91 = vector.shape_cast %90 : vector<1x8x8xf32> to vector<8x8xf32>
    %92 = vector.extract_strided_slice %85 {offsets = [3, 0, 0], sizes = [1, 8, 8], strides = [1, 1, 1]} : vector<4x8x8xf32> to vector<1x8x8xf32>
    %93 = vector.shape_cast %92 : vector<1x8x8xf32> to vector<8x8xf32>
    %94 = tpu.concatenate %87, %89, %91, %93 in 1 : vector<8x8xf32>, vector<8x8xf32>, vector<8x8xf32>, vector<8x8xf32> -> vector<8x32xf32>
    %95 = arith.truncf %94 : vector<8x32xf32> to vector<8x32xbf16>
    %c0_19 = arith.constant 0 : index
    %c0_20 = arith.constant 0 : index
    %96 = vector.load %arg5[%c0_19, %c0_20] : memref<32x32xbf16, #tpu.memory_space<vmem>>, vector<32x32xbf16>
    %cst_21 = arith.constant dense<0.000000e+00> : vector<8x32xf32>
    %97 = tpu.matmul %95, %96, %cst_21 {dimension_numbers = #tpu.dot_dimension_numbers<[1], [0], [0], [1], [0, 0, 1, 1], [], []>} : vector<8x32xbf16>, vector<32x32xbf16>, vector<8x32xf32> -> vector<8x32xf32>
    %c0_22 = arith.constant 0 : index
    %c0_23 = arith.constant 0 : index
    %98 = vector.load %arg6[%c0_22, %c0_23] : memref<1x32xf32, #tpu.memory_space<vmem>>, vector<1x32xf32>
    %99 = vector.broadcast %98 : vector<1x32xf32> to vector<8x32xf32>
    %100 = arith.addf %97, %99 : vector<8x32xf32>
    %101 = arith.addf %100, %2 : vector<8x32xf32>
    %c0_24 = arith.constant 0 : index
    %c0_25 = arith.constant 0 : index
    %102 = vector.load %arg7[%c0_24, %c0_25] : memref<1x32xf32, #tpu.memory_space<vmem>>, vector<1x32xf32>
    %c0_26 = arith.constant 0 : index
    %c0_27 = arith.constant 0 : index
    %103 = vector.load %arg8[%c0_26, %c0_27] : memref<1x32xf32, #tpu.memory_space<vmem>>, vector<1x32xf32>
    %cst_28 = arith.constant dense<0.000000e+00> : vector<8xf32>
    %104 = vector.multi_reduction <add>, %101, %cst_28 [1] : vector<8x32xf32> to vector<8xf32>
    %105 = vector.shape_cast %104 : vector<8xf32> to vector<8x1xf32>
    %cst_29 = arith.constant 3.200000e+01 : f32
    %106 = vector.broadcast %cst_29 : f32 to vector<8x1xf32>
    %107 = arith.divf %105, %106 : vector<8x1xf32>
    %108 = vector.broadcast %107 : vector<8x1xf32> to vector<8x32xf32>
    %109 = arith.subf %101, %108 : vector<8x32xf32>
    %110 = arith.mulf %109, %109 : vector<8x32xf32>
    %cst_30 = arith.constant dense<0.000000e+00> : vector<8xf32>
    %111 = vector.multi_reduction <add>, %110, %cst_30 [1] : vector<8x32xf32> to vector<8xf32>
    %112 = vector.shape_cast %111 : vector<8xf32> to vector<8x1xf32>
    %cst_31 = arith.constant 3.200000e+01 : f32
    %113 = vector.broadcast %cst_31 : f32 to vector<8x1xf32>
    %114 = arith.divf %112, %113 : vector<8x1xf32>
    %115 = vector.broadcast %107 : vector<8x1xf32> to vector<8x32xf32>
    %116 = arith.subf %101, %115 : vector<8x32xf32>
    %cst_32 = arith.constant 9.99999974E-6 : f32
    %117 = vector.broadcast %cst_32 : f32 to vector<8x1xf32>
    %118 = arith.addf %114, %117 : vector<8x1xf32>
    %119 = math.rsqrt %118 : vector<8x1xf32>
    %120 = vector.broadcast %119 : vector<8x1xf32> to vector<8x32xf32>
    %121 = arith.mulf %116, %120 : vector<8x32xf32>
    %122 = vector.broadcast %102 : vector<1x32xf32> to vector<8x32xf32>
    %123 = arith.mulf %121, %122 : vector<8x32xf32>
    %124 = vector.broadcast %103 : vector<1x32xf32> to vector<8x32xf32>
    %125 = arith.addf %123, %124 : vector<8x32xf32>
    %126 = arith.truncf %125 : vector<8x32xf32> to vector<8x32xbf16>
    %c0_33 = arith.constant 0 : index
    %c0_34 = arith.constant 0 : index
    %127 = vector.load %arg9[%c0_33, %c0_34] : memref<32x128xbf16, #tpu.memory_space<vmem>>, vector<32x128xbf16>
    %cst_35 = arith.constant dense<0.000000e+00> : vector<8x128xf32>
    %128 = tpu.matmul %126, %127, %cst_35 {dimension_numbers = #tpu.dot_dimension_numbers<[1], [0], [0], [1], [0, 0, 1, 1], [], []>} : vector<8x32xbf16>, vector<32x128xbf16>, vector<8x128xf32> -> vector<8x128xf32>
    %c0_36 = arith.constant 0 : index
    %c0_37 = arith.constant 0 : index
    %129 = vector.load %arg10[%c0_36, %c0_37] : memref<1x128xf32, #tpu.memory_space<vmem>>, vector<1x128xf32>
    %130 = vector.broadcast %129 : vector<1x128xf32> to vector<8x128xf32>
    %131 = arith.addf %128, %130 : vector<8x128xf32>
    %cst_38 = arith.constant 0.000000e+00 : f32
    %132 = vector.broadcast %cst_38 : f32 to vector<8x128xf32>
    %133 = arith.maximumf %131, %132 : vector<8x128xf32>
    %134 = arith.truncf %133 : vector<8x128xf32> to vector<8x128xbf16>
    %c0_39 = arith.constant 0 : index
    %c0_40 = arith.constant 0 : index
    %135 = vector.load %arg11[%c0_39, %c0_40] : memref<128x32xbf16, #tpu.memory_space<vmem>>, vector<128x32xbf16>
    %cst_41 = arith.constant dense<0.000000e+00> : vector<8x32xf32>
    %136 = tpu.matmul %134, %135, %cst_41 {dimension_numbers = #tpu.dot_dimension_numbers<[1], [0], [0], [1], [0, 0, 1, 1], [], []>} : vector<8x128xbf16>, vector<128x32xbf16>, vector<8x32xf32> -> vector<8x32xf32>
    %c0_42 = arith.constant 0 : index
    %c0_43 = arith.constant 0 : index
    %137 = vector.load %arg12[%c0_42, %c0_43] : memref<1x32xf32, #tpu.memory_space<vmem>>, vector<1x32xf32>
    %138 = vector.broadcast %137 : vector<1x32xf32> to vector<8x32xf32>
    %139 = arith.addf %136, %138 : vector<8x32xf32>
    %140 = arith.addf %139, %101 : vector<8x32xf32>
    %141 = arith.truncf %140 : vector<8x32xf32> to vector<8x32xbf16>
    %c0_44 = arith.constant 0 : index
    %c0_45 = arith.constant 0 : index
    %c0_46 = arith.constant 0 : index
    %142 = vector.load %arg13[%c0_44, %c0_45, %c0_46] : memref<1x8x32xbf16, #tpu.memory_space<vmem>>, vector<1x8x32xbf16>
    %143 = vector.shape_cast %142 : vector<1x8x32xbf16> to vector<8x32xbf16>
    %144 = vector.shape_cast %141 : vector<8x32xbf16> to vector<1x8x32xbf16>
    tpu.vector_store %arg13[%c0_44, %c0_45, %c0_46], %144 {strides = array<i32>} : memref<1x8x32xbf16, #tpu.memory_space<vmem>>, vector<1x8x32xbf16>,
    return
  }
  func.func @transform_0(%arg0: i32) -> (i32, i32, i32) {
    %c0_i32 = arith.constant 0 : i32
    %c0_i32_0 = arith.constant 0 : i32
    %c0_i32_1 = arith.constant 0 : i32
    return %arg0, %c0_i32, %c0_i32_0 : i32, i32, i32
  }
  func.func @transform_1(%arg0: i32) -> (i32, i32) {
    %c0_i32 = arith.constant 0 : i32
    %c0_i32_0 = arith.constant 0 : i32
    %c0_i32_1 = arith.constant 0 : i32
    return %c0_i32, %c0_i32_0 : i32, i32
  }
  func.func @transform_2(%arg0: i32) -> (i32, i32) {
    %c0_i32 = arith.constant 0 : i32
    %c0_i32_0 = arith.constant 0 : i32
    %c0_i32_1 = arith.constant 0 : i32
    return %c0_i32, %c0_i32_0 : i32, i32
  }
  func.func @transform_3(%arg0: i32) -> (i32, i32) {
    %c0_i32 = arith.constant 0 : i32
    %c0_i32_0 = arith.constant 0 : i32
    %c0_i32_1 = arith.constant 0 : i32
    return %c0_i32, %c0_i32_0 : i32, i32
  }
  func.func @transform_4(%arg0: i32) -> (i32, i32) {
    %c0_i32 = arith.constant 0 : i32
    %c0_i32_0 = arith.constant 0 : i32
    %c0_i32_1 = arith.constant 0 : i32
    return %c0_i32, %c0_i32_0 : i32, i32
  }
  func.func @transform_5(%arg0: i32) -> (i32, i32) {
    %c0_i32 = arith.constant 0 : i32
    %c0_i32_0 = arith.constant 0 : i32
    %c0_i32_1 = arith.constant 0 : i32
    return %c0_i32, %c0_i32_0 : i32, i32
  }
  func.func @transform_6(%arg0: i32) -> (i32, i32) {
    %c0_i32 = arith.constant 0 : i32
    %c0_i32_0 = arith.constant 0 : i32
    %c0_i32_1 = arith.constant 0 : i32
    return %c0_i32, %c0_i32_0 : i32, i32
  }
  func.func @transform_7(%arg0: i32) -> (i32, i32) {
    %c0_i32 = arith.constant 0 : i32
    %c0_i32_0 = arith.constant 0 : i32
    %c0_i32_1 = arith.constant 0 : i32
    return %c0_i32, %c0_i32_0 : i32, i32
  }
  func.func @transform_8(%arg0: i32) -> (i32, i32) {
    %c0_i32 = arith.constant 0 : i32
    %c0_i32_0 = arith.constant 0 : i32
    %c0_i32_1 = arith.constant 0 : i32
    return %c0_i32, %c0_i32_0 : i32, i32
  }
  func.func @transform_9(%arg0: i32) -> (i32, i32) {
    %c0_i32 = arith.constant 0 : i32
    %c0_i32_0 = arith.constant 0 : i32
    %c0_i32_1 = arith.constant 0 : i32
    return %c0_i32, %c0_i32_0 : i32, i32
  }
  func.func @transform_10(%arg0: i32) -> (i32, i32) {
    %c0_i32 = arith.constant 0 : i32
    %c0_i32_0 = arith.constant 0 : i32
    %c0_i32_1 = arith.constant 0 : i32
    return %c0_i32, %c0_i32_0 : i32, i32
  }
  func.func @transform_11(%arg0: i32) -> (i32, i32) {
    %c0_i32 = arith.constant 0 : i32
    %c0_i32_0 = arith.constant 0 : i32
    %c0_i32_1 = arith.constant 0 : i32
    return %c0_i32, %c0_i32_0 : i32, i32
  }
  func.func @transform_12(%arg0: i32) -> (i32, i32, i32) {
    %c0_i32 = arith.constant 0 : i32
    %c0_i32_0 = arith.constant 0 : i32
    %c0_i32_1 = arith.constant 0 : i32
    return %arg0, %c0_i32, %c0_i32_0 : i32, i32, i32
  }
}

</mosaic_0001>

<bundles_post_ra>
// kernel: tpu_custom_call.1
= control target key start
LH: loop header
LB: loop body
LE: loop exit
PB: predicated region body
PF: predicated region fallthrough
CT: control target
= control target key end

     0   :  { %s2005_s0 = inlined_call_operand.vmem [shape: bf16[2,8,32], index: 0, kind: input, shape index: {}]   ;;  %s2006_s1 = inlined_call_operand.vmem [shape: f32[1,32], index: 1, kind: input, shape index: {}]   ;;  %s2007_s2 = inlined_call_operand.vmem [shape: f32[1,32], index: 2, kind: input, shape index: {}]   ;;  %s2008_s3 = inlined_call_operand.vmem [shape: bf16[32,96], index: 3, kind: input, shape index: {}]   ;;  %s2009_s4 = inlined_call_operand.vmem [shape: bf16[32,32], index: 4, kind: input, shape index: {}]   ;;  %s2010_s5 = inlined_call_operand.vmem [shape: f32[1,32], index: 5, kind: input, shape index: {}]   ;;  %s2011_s6 = inlined_call_operand.vmem [shape: f32[1,32], index: 6, kind: input, shape index: {}]   ;;  %s2012_s7 = inlined_call_operand.vmem [shape: f32[1,32], index: 7, kind: input, shape index: {}]   ;;  %s2013_s8 = inlined_call_operand.vmem [shape: bf16[32,128], index: 8, kind: input, shape index: {}]   ;;  %s2014_s9 = inlined_call_operand.vmem [shape: f32[1,128], index: 9, kind: input, shape index: {}]   ;;  %s2015_s10 = inlined_call_operand.vmem [shape: bf16[128,32], index: 10, kind: input, shape index: {}]   ;;  %s2016_s11 = inlined_call_operand.vmem [shape: f32[1,32], index: 11, kind: input, shape index: {}]   ;;  %s2017_s12 = inlined_call_operand.hbm [shape: bf16[2,8,32], index: 12, kind: output, shape index: {}]  }
   0x1   :  { %2018 = sst [smem:[#allocation5_spill]] %s2005_s0 }
   0x2   :  { %2019 = sst [smem:[#allocation6_spill]] %s2006_s1 }
   0x3   :  { %17 = vsyncpa [#allocation3], 0 }
   0x4   :  { %19 = vsyncpa [#allocation3 + $0x1], 0  ;;  %s1727_s21 = smov 0   ;;  %s1729_s22 = smov 0  }
   0x5   :  { %s1731_s23 = smov 0   ;;  %s1733_s24 = smov 0  }
   0x6 LB: > { %s1748_s25 = sadd.s32 4294967295, %s1649_s24   ;;  %s1336_s26 = sadd.s32 4294967294, %s1649_s24   ;;  %s1649_s24 = sphi %s1733_s24, %s2027_s24   ;;  %s1645_s23 = sphi %s1731_s23, %s2026_s23   ;;  %s1641_s22 = sphi %s1729_s22, %s2025_s22   ;;  %s1637_s21 = sphi %s1727_s21, %s2024_s21  }
   0x7   : > { %s1752_s27 = sadd.s32 1, %s1649_s24   ;;  %s289_s28 = sadd.s32 1, %s1645_s23 }
   0x8   : > { %s286_s29 = ssub.s32 %s1649_s24, %s1752_s27  ;;  %p299_p0 = scmp.ne.s32.totalorder %s1645_s23, %s1641_s22 }
   0x9   : > { %p287_p1 = scmp.eq.s32.totalorder %s286_s29, 0  ;;  %p300_p2 = scmp.eq.s32.totalorder %s1748_s25, 1 }
   0xa   : > { %p305_p3 = scmp.ne.s32.totalorder %s1641_s22, %s1637_s21  ;;  %p306_p4 = scmp.eq.s32.totalorder %s1336_s26, 1 }
   0xb   : > { %s1763_s30 = scalar_select %p287_p1, %s1645_s23, %s289_s28  }
   0xc   : > { %p1765_p5 = por %p300_p2, %p299_p0  ;;  %p1769_p6 = por %p306_p4, %p305_p3 }
   0xd   : > { %p1339_p7 = scmp.ge.s32.totalorder %s1649_s24, 1  ;;  %p364_p8 = scmp.lt.s32.totalorder %s1649_s24, 3 }
   0xf   : > { %p365_p9 = pnand %p1339_p7, %p364_p8 }
  0x10   : > { %p405_p10 = scmp.lt.s32.totalorder (!%p365_p9), %s1748_s25, 1  ;;  %vm414_vm0 = vcmask (!%p365_p9), 261120   ;;  %s2022_s0 = sld [smem:[#allocation5_spill]] (!%p365_p9)  ;;  %v1553_v8 = vld [vmem:[%s2008_s3] sm:$0xff] (!%p365_p9)   ;;  %v1651_v9 = vmov (!%p365_p9), 0.0   ;;  %vm1652_vm1 = vmmov (!%p365_p9), 0   ;;  %v713_v42 = vlaneseq (!%p365_p9) }
  0x11   : > { %368 = sbr.rel (%p365_p9) target bundleno = 2646 (0xa56), region = 68  ;;  %1412 = vmatprep.subr.bf16.mxu0 (!%p365_p9), %v1651_v9  ;;  %1416 = vmatprep.mubr.msk.bf16.mxu0 (!%p365_p9), %vm1652_vm1, %v1651_v9  ;;  %v1554_v10 = vld [vmem:[%s2008_s3 + $0x8] sm:$0xff] (!%p365_p9)   ;;  %s2023_s1 = sld [smem:[#allocation6_spill]] (!%p365_p9)  ;;  %v1343_v17 = vld [vmem:[%s2007_s2] ss:$0 sm:$0xff] (!%p365_p9)  ;;  %vm522_vm2 = vcmask (!%p365_p9), 64512  }
  0x12   : > { %1413 = vmatpush3.bf16.msra.mxu0 (!%p365_p9), %v1553_v8  ;;  %1432 = vmatprep.subr.bf16.mxu1 (!%p365_p9), %v1651_v9  ;;  %s1654_s20 = smov (!%p365_p9), 120   ;;  %s1655_s26 = smov (!%p365_p9), 112   ;;  %v714_v43 = vshrl.u32 (!%p365_p9), %v713_v42, 7  ;;  %v716_v44 = vand.u32 (!%p365_p9), 127, %v713_v42  ;;  %vm777_vm4 = vcmask (!%p365_p9), 1043456   ;;  %vm978_vm5 = vcmask (!%p365_p9), 130048  }
  0x13   : > { %1414 = vmatprep.subr.bf16.mxu0 (!%p365_p9), %v1651_v9  ;;  %1434 = vmatprep.mubr.msk.bf16.mxu1 (!%p365_p9), %vm1652_vm1, %v1651_v9  ;;  %s1656_s28 = smov (!%p365_p9), 96   ;;  %s1657_s29 = smov (!%p365_p9), 64   ;;  %vm980_vm6 = vcmask (!%p365_p9), 195584   ;;  %vm1261_vm7 = vcmask (!%p365_p9), 257024  }
  0x14   : > { %vm717_vm3 = vcmp.ge.s32.totalorder (!%p365_p9), %v714_v43, %v716_v44  ;;  %s1375_s18 = sshll.u32 (!%p365_p9), %s1748_s25, 6 }
  0x16   : > { %1415 = vmatpush3.bf16.msra.mxu0 (!%p365_p9), %v1554_v10 }
  0x17   : > { %1420 = vmatprep.subr.bf16.mxu0 (!%p365_p9), %v1651_v9  ;;  %v1342_v15 = vld [vmem:[%s2023_s1] ss:$0 sm:$0xff] (!%p365_p9) }
  0x18   : > { %s406_s15 = scalar_select %p405_p10, %s1748_s25, 1 }
  0x1a   : > { %s1341_s16 = sshll.u32 %s406_s15, 2 }
  0x1b   : > { %s408_s19 = scalar_lea.vmem %s2022_s0, %s1341_s16  ;;  %s1963_s0 = scalar_lea.hbm %s2017_s12, %s1375_s18 }
  0x1c   : > { %v410_v0 = vld [vmem:[%s408_s19] sm:$0xf]  ;;  %s1653_s19 = smov 104  }
  0x1d   : > { %v1780_v1 = vunpack.c.l.bf16 %v410_v0 }
  0x1f   : > { %v415_v2 = vsel %vm414_vm0, %v1780_v1, 0.0 }
  0x20   : > { %416 = vadd.xlane.f32.xlu0 %v415_v2 }
  0xad   : > { %v417_v3 = vpop.xlane.xlu0 %416 }
  0xae   : > { %v419_v4 = vmul.f32 0.03125, %v417_v3 }
  0xb0   : > { %v420_v5 = vsub.f32 %v1780_v1, %v419_v4 }
  0xb2   : > { %v421_v6 = vmul.f32 %v420_v5, %v420_v5 }
  0xb4   : > { %v422_v7 = vsel %vm414_vm0, %v421_v6, 0.0 }
  0xb5   : > { %423 = vadd.xlane.f32.xlu0 %v422_v7 }
 0x142   : > { %v424_v11 = vpop.xlane.xlu0 %423 }
 0x143   : > { %v425_v12 = vmul.f32 0.03125, %v424_v11 }
 0x145   : > { %v426_v13 = vadd.f32 1e-05, %v425_v12 }
 0x147   : > { %1567 = vrsqrt.f32 %v426_v13 }
 0x151   : > { %v1568_v14 = vpop.eup %1567 }
 0x152   : > { %v428_v16 = vmul.f32 %v1568_v14, %v420_v5 }
 0x154   : > { %v435_v18 = vmul.f32 %v1342_v15, %v428_v16 }
 0x156   : > { %v442_v19 = vadd.f32 %v1343_v17, %v435_v18 }
 0x158   : > { %v443_v20 = vpack.c.bf16 %v442_v19, %v442_v19 }
 0x15a   : > { %1417 = vmatmul.mubr.msk.bf16.vlgmr.msra.gmra.mrb[0].mxu0 %vm414_vm0, %v443_v20 }
 0x15b   : > { %1422 = vmatprep.mubr.msk.bf16.mxu0 %vm1652_vm1, %v1651_v9 }
 0x22d   : > { %v497_v21 = vpop.f32.mrb[0].mxu0 }
 0x22e   : > { %v503_v22 = vmul.f32 0.17677669, %v497_v21  ;;  %v1809_v23 = vpack.c.bf16 %v497_v21, %v497_v21  ;;  %v1418_v24 = vpop.f32.mrb[1].mxu0 }
 0x22f   : > { %v500_v25 = vpop.f32.mrb[2].mxu0 }
 0x230   : > { %518 = vrot.lane.b32.xlu0 %v1809_v23, %s1653_s19  ;;  %514 = vrot.lane.b32.xlu1 %v1809_v23, %s1654_s20  ;;  %v1419_v26 = vpop.f32.mrb[3].mxu0  ;;  %v504_v27 = vpack.c.bf16 %v503_v22, %v503_v22 }
 0x234   : > { %516 = vrot.lane.b32.xlu1 %v1809_v23, %s1655_s26  ;;  %511 = vrot.lane.b32.xlu0 %v504_v27, %s1653_s19  ;;  %s1658_s19 = smov 8  }
 0x238   : > { %520 = vrot.lane.b32.xlu1 %v1809_v23, %s1656_s28 }
 0x23c   : > { %507 = vrot.lane.b32.xlu1 %v504_v27, %s1654_s20  ;;  %s1659_s20 = smov 16  }
 0x2a2   : > { %v1815_v28 = vpop.permute.xlu1 %514  ;;  %v1821_v30 = vpop.permute.xlu0 %518 }
 0x2a3   : > { %569 = vrot.lane.b32.xlu1 %v1815_v28, %s1656_s28 }
 0x2a6   : > { %v1818_v29 = vpop.permute.xlu1 %516  ;;  %v512_v41 = vpop.permute.xlu0 %511 }
 0x2a7   : > { %617 = vrot.lane.b32.xlu1 %v1818_v29, %s1656_s28 }
 0x2aa   : > { %v521_v31 = vpop.permute.xlu1 %520 }
 0x2ab   : > { %v527_v32 = vsel %vm522_vm2, %v521_v31, 0  ;;  %665 = vrot.lane.b32.xlu1 %v1821_v30, %s1656_s28 }
 0x2ac   : > { %1421 = vmatpush3.bf16.xpose.msra.mxu0 %v527_v32 }
 0x2ad   : > { %1426 = vmatprep.subr.bf16.mxu0 %v1651_v9 }
 0x2ae   : > { %v508_v33 = vpop.permute.xlu1 %507 }
 0x2af   : > { %509 = vrot.lane.b32.xlu1 %v504_v27, %s1655_s26  ;;  %s1660_s26 = smov 24  }
 0x2b3   : > { %1423 = vmatmul.mubr.msk.bf16.vlgmr.msra.gmra.mrb[4].mxu0 %vm522_vm2, %v504_v27 }
 0x2b4   : > { %1428 = vmatprep.mubr.msk.bf16.mxu0 %vm1652_vm1, %v1651_v9 }
 0x315   : > { %v570_v34 = vpop.permute.xlu1 %569 }
 0x316   : > { %v575_v35 = vsel %vm522_vm2, %v570_v34, 0 }
 0x317   : > { %1427 = vmatpush3.bf16.xpose.msra.mxu0 %v575_v35 }
 0x318   : > { %1438 = vmatprep.subr.bf16.mxu0 %v1651_v9 }
 0x319   : > { %v618_v36 = vpop.permute.xlu1 %617 }
 0x31a   : > { %v623_v37 = vsel %vm522_vm2, %v618_v36, 0 }
 0x31b   : > { %1433 = vmatpush3.bf16.xpose.msra.mxu1 %v623_v37 }
 0x31c   : > { %1444 = vmatprep.subr.bf16.mxu1 %v1651_v9 }
 0x31d   : > { %v666_v38 = vpop.permute.xlu1 %665 }
 0x31e   : > { %v671_v39 = vsel %vm522_vm2, %v666_v38, 0  ;;  %1429 = vmatmul.mubr.msk.bf16.vlgmr.msra.gmra.mrb[8].mxu0 %vm522_vm2, %v508_v33 }
 0x31f   : > { %1439 = vmatpush3.bf16.xpose.msra.mxu0 %v671_v39  ;;  %1440 = vmatprep.mubr.msk.bf16.mxu0 %vm1652_vm1, %v1651_v9 }
 0x320   : > { %1450 = vmatprep.subr.bf16.mxu0 %v1651_v9 }
 0x321   : > { %v510_v40 = vpop.permute.xlu1 %509 }
 0x322   : > { %1435 = vmatmul.mubr.msk.bf16.vlgmr.msra.gmra.mrb[0].mxu1 %vm522_vm2, %v510_v40 }
 0x323   : > { %1446 = vmatprep.mubr.msk.bf16.mxu1 %vm1652_vm1, %v1651_v9 }
 0x326   : > { %1441 = vmatmul.mubr.msk.bf16.vlgmr.msra.gmra.mrb[12].mxu0 %vm522_vm2, %v512_v41 }
 0x327   : > { %1452 = vmatprep.mubr.msk.bf16.mxu0 %vm1652_vm1, %v1651_v9 }
 0x386   : > { %v563_v45 = vpop.f32.mrb[4].mxu0 }
 0x387   : > { %v720_v46 = vsel %vm717_vm3, %v563_v45, -1e+30  ;;  %v1424_v47 = vpop.f32.mrb[5].mxu0 }
 0x388   : > { %v566_v48 = vpop.f32.mrb[6].mxu0  ;;  %v724_v49 = vsel %vm522_vm2, %v720_v46, -inf }
 0x389   : > { %725 = vmax.xlane.f32.xlu1 %v724_v49  ;;  %v1425_v50 = vpop.f32.mrb[7].mxu0 }
 0x3f1   : > { %v611_v51 = vpop.f32.mrb[8].mxu0 }
 0x3f2   : > { %v721_v52 = vsel %vm717_vm3, %v611_v51, -1e+30  ;;  %v1430_v53 = vpop.f32.mrb[9].mxu0 }
 0x3f3   : > { %v614_v54 = vpop.f32.mrb[10].mxu0  ;;  %v727_v55 = vsel %vm522_vm2, %v721_v52, -inf }
 0x3f4   : > { %728 = vmax.xlane.f32.xlu0 %v727_v55  ;;  %v1431_v56 = vpop.f32.mrb[11].mxu0  ;;  %v1555_v55 = vld [vmem:[%s2009_s4] sm:$0xff]  }
 0x3f5   : > { %v659_v57 = vpop.f32.mrb[0].mxu1  ;;  %v1556_v56 = vld [vmem:[%s2009_s4 + $0x8] sm:$0xff]  }
 0x3f6   : > { %v722_v58 = vsel %vm717_vm3, %v659_v57, -1e+30  ;;  %v1436_v59 = vpop.f32.mrb[1].mxu1 }
 0x3f7   : > { %v662_v60 = vpop.f32.mrb[2].mxu1  ;;  %v730_v61 = vsel %vm522_vm2, %v722_v58, -inf }
 0x3f8   : > { %v1437_v62 = vpop.f32.mrb[3].mxu1  ;;  %731 = vmax.xlane.f32.xlu0 %v730_v61 }
 0x3f9   : > { %v707_v63 = vpop.f32.mrb[12].mxu0 }
 0x3fa   : > { %v723_v0 = vsel %vm717_vm3, %v707_v63, -1e+30  ;;  %v1442_v2 = vpop.f32.mrb[13].mxu0 }
 0x3fb   : > { %v710_v3 = vpop.f32.mrb[14].mxu0  ;;  %v733_v4 = vsel %vm522_vm2, %v723_v0, -inf }
 0x3fc   : > { %734 = vmax.xlane.f32.xlu1 %v733_v4  ;;  %v1443_v5 = vpop.f32.mrb[15].mxu0 }
 0x40d   : > { %821 = vrot.lane.b32.xlu1 %v1815_v28, %s1657_s29 }
 0x40e   : > { %772 = vrot.lane.b32.xlu0 %v1809_v23, %s1657_s29 }
 0x416   : > { %v726_v6 = vpop.xlane.xlu1 %725 }
 0x417   : > { %v736_v7 = vsub.f32 %v720_v46, %v726_v6 }
 0x419   : > { %v740_v8 = vmul.f32 1.442695, %v736_v7 }
 0x41b   : > { %1569 = vpow2.f32 %v740_v8 }
 0x425   : > { %v1570_v10 = vpop.eup %1569 }
 0x426   : > { %v748_v11 = vsel %vm522_vm2, %v1570_v10, 0.0 }
 0x42d   : > { %749 = vadd.xlane.f32.xlu0 %v748_v11 }
 0x481   : > { %v729_v12 = vpop.xlane.xlu0 %728 }
 0x482   : > { %v737_v13 = vsub.f32 %v721_v52, %v729_v12 }
 0x484   : > { %v742_v14 = vmul.f32 1.442695, %v737_v13 }
 0x485   : > { %v732_v15 = vpop.xlane.xlu0 %731 }
 0x486   : > { %1571 = vpow2.f32 %v742_v14  ;;  %v738_v16 = vsub.f32 %v722_v58, %v732_v15  ;;  %v1355_v14 = vld [vmem:[%s2010_s5] ss:$0 sm:$0xff] }
 0x488   : > { %v744_v17 = vmul.f32 1.442695, %v738_v16 }
 0x489   : > { %v773_v18 = vpop.permute.xlu0 %772  ;;  %v735_v19 = vpop.xlane.xlu1 %734 }
 0x48a   : > { %1573 = vpow2.f32 %v744_v17  ;;  %v779_v20 = vsel %vm777_vm4, %v773_v18, 0  ;;  %v739_v21 = vsub.f32 %v723_v0, %v735_v19 }
 0x48b   : > { %1445 = vmatpush3.bf16.msra.mxu1 %v779_v20 }
 0x48c   : > { %v746_v22 = vmul.f32 1.442695, %v739_v21  ;;  %1456 = vmatprep.subr.bf16.mxu1 %v1651_v9 }
 0x48d   : > { %v822_v23 = vpop.permute.xlu1 %821 }
 0x48e   : > { %1575 = vpow2.f32 %v746_v22  ;;  %v827_v24 = vsel %vm777_vm4, %v822_v23, 0 }
 0x48f   : > { %1451 = vmatpush3.bf16.msra.mxu0 %v827_v24 }
 0x490   : > { %v1572_v25 = vpop.eup %1571  ;;  %1462 = vmatprep.subr.bf16.mxu0 %v1651_v9 }
 0x491   : > { %v751_v26 = vsel %vm522_vm2, %v1572_v25, 0.0 }
 0x492   : > { %752 = vadd.xlane.f32.xlu1 %v751_v26 }
 0x494   : > { %v1574_v27 = vpop.eup %1573 }
 0x495   : > { %v754_v28 = vsel %vm522_vm2, %v1574_v27, 0.0 }
 0x496   : > { %755 = vadd.xlane.f32.xlu0 %v754_v28  ;;  %v1559_v28 = vld [vmem:[%s2015_s10] sm:$0xff]  }
 0x498   : > { %v1576_v31 = vpop.eup %1575 }
 0x499   : > { %v757_v32 = vsel %vm522_vm2, %v1576_v31, 0.0 }
 0x49a   : > { %758 = vadd.xlane.f32.xlu1 %v757_v32  ;;  %v1561_v32 = vld [vmem:[%s2015_s10 + $0x10] sm:$0xff]  }
 0x4ab   : > { %869 = vrot.lane.b32.xlu1 %v1818_v29, %s1657_s29 }
 0x4ac   : > { %917 = vrot.lane.b32.xlu0 %v1821_v30, %s1657_s29  ;;  %s402_s29 = sand.u32 1, %s1641_s22  }
 0x4ad   : > { %s1340_s15 = sshll.u32 %s402_s29, 2  ;;  %s1264_s16 = scalar_lea.sflag [#allocation3], %s402_s29 }
 0x4ba   : > { %v750_v33 = vpop.xlane.xlu0 %749 }
 0x4bb   : > { %1577 = vrcp.f32 %v750_v33  ;;  %v1562_v33 = vld [vmem:[%s2015_s10 + $0x18] sm:$0xff]  }
 0x4c5   : > { %v1578_v34 = vpop.eup %1577 }
 0x4c6   : > { %v764_v35 = vmul.f32 %v1578_v34, %v1570_v10  ;;  %v1563_v34 = vld [vmem:[%s2015_s10 + $0x20] sm:$0xff]  }
 0x4c8   : > { %v768_v36 = vpack.c.bf16 %v764_v35, %v764_v35  ;;  %v1564_v35 = vld [vmem:[%s2015_s10 + $0x28] sm:$0xff]  }
 0x4ca   : > { %1447 = vmatmul.mubr.msk.bf16.vlgmr.msra.gmra.mrb[4].mxu1 %vm522_vm2, %v768_v36 }
 0x4cb   : > { %1458 = vmatprep.mubr.msk.bf16.mxu1 %vm1652_vm1, %v1651_v9 }
 0x51f   : > { %v753_v37 = vpop.xlane.xlu1 %752 }
 0x520   : > { %1579 = vrcp.f32 %v753_v37 }
 0x523   : > { %v756_v38 = vpop.xlane.xlu0 %755 }
 0x524   : > { %1581 = vrcp.f32 %v756_v38 }
 0x527   : > { %v759_v39 = vpop.xlane.xlu1 %758  ;;  %v918_v30 = vpop.permute.xlu0 %917 }
 0x528   : > { %1583 = vrcp.f32 %v759_v39  ;;  %v923_v46 = vsel %vm777_vm4, %v918_v30, 0 }
 0x52a   : > { %v1580_v29 = vpop.eup %1579 }
 0x52b   : > { %v765_v40 = vmul.f32 %v1580_v29, %v1572_v25  ;;  %v870_v41 = vpop.permute.xlu1 %869  ;;  %v1359_v29 = vld [vmem:[%s2011_s6] ss:$0 sm:$0xff] }
 0x52c   : > { %v875_v42 = vsel %vm777_vm4, %v870_v41, 0  ;;  %v1360_v41 = vld [vmem:[%s2012_s7] ss:$0 sm:$0xff] }
 0x52d   : > { %1457 = vmatpush3.bf16.msra.mxu1 %v875_v42  ;;  %v769_v43 = vpack.c.bf16 %v765_v40, %v765_v40 }
 0x52e   : > { %v1582_v44 = vpop.eup %1581  ;;  %1468 = vmatprep.subr.bf16.mxu1 %v1651_v9 }
 0x52f   : > { %v766_v45 = vmul.f32 %v1582_v44, %v1574_v27  ;;  %1453 = vmatmul.mubr.msk.bf16.vlgmr.msra.gmra.mrb[16].mxu0 %vm522_vm2, %v769_v43  ;;  %v1557_v27 = vld [vmem:[%s2013_s8] sm:$0xff]   ;;  %v1565_v44 = vld [vmem:[%s2015_s10 + $0x30] sm:$0xff]  }
 0x530   : > { %1463 = vmatpush3.bf16.msra.mxu0 %v923_v46  ;;  %1464 = vmatprep.mubr.msk.bf16.mxu0 %vm1652_vm1, %v1651_v9  ;;  %v1361_v46 = vld [vmem:[%s2014_s9] ss:$0 sm:$0xff] }
 0x531   : > { %v770_v47 = vpack.c.bf16 %v766_v45, %v766_v45  ;;  %1476 = vmatprep.subr.bf16.mxu0 %v1651_v9  ;;  %v1566_v45 = vld [vmem:[%s2015_s10 + $0x38] sm:$0xff]  }
 0x532   : > { %v1584_v48 = vpop.eup %1583 }
 0x533   : > { %v767_v49 = vmul.f32 %v1584_v48, %v1576_v31  ;;  %1459 = vmatmul.mubr.msk.bf16.vlgmr.msra.gmra.mrb[8].mxu1 %vm522_vm2, %v770_v47  ;;  %v1560_v31 = vld [vmem:[%s2015_s10 + $0x8] sm:$0xff]  }
 0x534   : > { %1472 = vmatprep.mubr.msk.bf16.mxu1 %vm1652_vm1, %v1651_v9  ;;  %1469 = vmatpush3.bf16.msra.mxu1 %v1555_v55 }
 0x535   : > { %v771_v50 = vpack.c.bf16 %v767_v49, %v767_v49  ;;  %1470 = vmatprep.subr.bf16.mxu1 %v1651_v9 }
 0x537   : > { %1465 = vmatmul.mubr.msk.bf16.vlgmr.msra.gmra.mrb[20].mxu0 %vm522_vm2, %v771_v50 }
 0x538   : > { %1480 = vmatprep.mubr.msk.bf16.mxu0 %vm1652_vm1, %v1651_v9  ;;  %1471 = vmatpush3.bf16.msra.mxu1 %v1556_v56 }
 0x539   : > { %1484 = vmatprep.subr.bf16.mxu1 %v1651_v9  ;;  %1477 = vmatpush3.bf16.msra.mxu0 %v1557_v27 }
 0x53a   : > { %1478 = vmatprep.subr.bf16.mxu0 %v1651_v9 }
 0x59d   : > { %v815_v51 = vpop.f32.mrb[4].mxu1 }
 0x59e   : > { %v1448_v52 = vpop.f32.mrb[5].mxu1 }
 0x59f   : > { %v818_v53 = vpop.f32.mrb[6].mxu1 }
 0x5a0   : > { %v1449_v54 = vpop.f32.mrb[7].mxu1 }
 0x602   : > { %v863_v57 = vpop.f32.mrb[16].mxu0 }
 0x603   : > { %966 = vrot.lane.b32.xlu1 %v863_v57, %s1658_s19  ;;  %v1454_v58 = vpop.f32.mrb[17].mxu0  ;;  %s404_s19 = scalar_lea.vmem [#allocation2], %s1340_s15  ;;  %s1661_s15 = smov [#allocation2]  }
 0x604   : > { %v866_v59 = vpop.f32.mrb[18].mxu0  ;;  %s1591_s17 = sshll.u32 %s1661_s15, 4  ;;  %s1592_s17 = int_to_ptr.vmem [resolvable:$false] %s1591_s17 }
 0x605   : > { %v1455_v60 = vpop.f32.mrb[19].mxu0  ;;  %s1593_s1 = scalar_lea.vmem %s1592_s17, 128 }
 0x606   : > { %v911_v61 = vpop.f32.mrb[8].mxu1 }
 0x607   : > { %970 = vrot.lane.b32.xlu0 %v911_v61, %s1659_s20  ;;  %v1460_v62 = vpop.f32.mrb[9].mxu1  ;;  %s1277_s20 = sshll.u32 %s404_s19, 4  ;;  %s1965_s20 = int_to_ptr.vmem [resolvable:$true] %s1277_s20 }
 0x608   : > { %v914_v63 = vpop.f32.mrb[10].mxu1  ;;  %s1587_s25 = scalar_lea.vmem %s1965_s20, 64  ;;  %p1594_p0 = scmp.lt.s32.totalorder %s1965_s20, %s1592_s17 }
 0x609   : > { %v1461_v0 = vpop.f32.mrb[11].mxu1  ;;  %p1588_p11 = scmp.ne.s32.totalorder %s1965_s20, %s1587_s25  ;;  %p1595_p1 = scmp.lt.s32.totalorder %s1593_s1, %s1587_s25 }
 0x60a   : > { %v959_v2 = vpop.f32.mrb[20].mxu0 }
 0x60b   : > { %974 = vrot.lane.b32.xlu1 %v959_v2, %s1660_s26  ;;  %v1466_v3 = vpop.f32.mrb[21].mxu0  ;;  %p1589_p12 = pnand %p1588_p11, %p1765_p5  ;;  %p1596_p2 = por %p1595_p1, %p1594_p0 }
 0x60c   : > { %v962_v4 = vpop.f32.mrb[22].mxu0 }
 0x60d   : > { %v1467_v5 = vpop.f32.mrb[23].mxu0  ;;  %p1590_p13 = pneg %p1589_p12 }
 0x60f   : > { %p1597_p3 = pnand %p1596_p2, %p1590_p13 }
 0x675   : > { %v967_v6 = vpop.permute.xlu1 %966 }
 0x676   : > { %v977_v8 = vsel %vm522_vm2, %v815_v51, %v967_v6 }
 0x679   : > { %v971_v7 = vpop.permute.xlu0 %970 }
 0x67a   : > { %v979_v10 = vsel %vm978_vm5, %v977_v8, %v971_v7 }
 0x67d   : > { %v975_v11 = vpop.permute.xlu1 %974 }
 0x67e   : > { %v981_v12 = vsel %vm980_vm6, %v979_v10, %v975_v11 }
 0x67f   : > { %v982_v13 = vpack.c.bf16 %v981_v12, %v981_v12 }
 0x681   : > { %1473 = vmatmul.mubr.msk.bf16.vlgmr.msra.gmra.mrb[12].mxu1 %vm414_vm0, %v982_v13 }
 0x682   : > { %1500 = vmatprep.mubr.msk.bf16.mxu1 %vm1652_vm1, %v1651_v9  ;;  %1485 = vmatpush3.bf16.msra.mxu1 %v1559_v28 }
 0x683   : > { %1486 = vmatprep.subr.bf16.mxu1 %v1651_v9 }
 0x686   : > { %1487 = vmatpush3.bf16.msra.mxu1 %v1560_v31 }
 0x687   : > { %1488 = vmatprep.subr.bf16.mxu1 %v1651_v9 }
 0x68a   : > { %1489 = vmatpush3.bf16.msra.mxu1 %v1561_v32 }
 0x68b   : > { %1490 = vmatprep.subr.bf16.mxu1 %v1651_v9 }
 0x68e   : > { %1491 = vmatpush3.bf16.msra.mxu1 %v1562_v33 }
 0x68f   : > { %1492 = vmatprep.subr.bf16.mxu1 %v1651_v9 }
 0x692   : > { %1493 = vmatpush3.bf16.msra.mxu1 %v1563_v34 }
 0x693   : > { %1494 = vmatprep.subr.bf16.mxu1 %v1651_v9 }
 0x696   : > { %1495 = vmatpush3.bf16.msra.mxu1 %v1564_v35 }
 0x697   : > { %1496 = vmatprep.subr.bf16.mxu1 %v1651_v9 }
 0x69a   : > { %1497 = vmatpush3.bf16.msra.mxu1 %v1565_v44 }
 0x69b   : > { %1498 = vmatprep.subr.bf16.mxu1 %v1651_v9  ;;  %v1365_v9 = vld [vmem:[%s2016_s11] ss:$0 sm:$0xff] }
 0x69e   : > { %1499 = vmatpush3.bf16.msra.mxu1 %v1566_v45 }
 0x754   : > { %v1043_v15 = vpop.f32.mrb[12].mxu1 }
 0x755   : > { %v1044_v16 = vadd.f32 %v1355_v14, %v1043_v15  ;;  %v1474_v17 = vpop.f32.mrb[13].mxu1 }
 0x756   : > { %v1046_v18 = vpop.f32.mrb[14].mxu1 }
 0x757   : > { %v1900_v19 = vadd.f32 %v1044_v16, %v1780_v1  ;;  %v1475_v20 = vpop.f32.mrb[15].mxu1  ;;  %v1558_v1 = vld [vmem:[%s2013_s8 + $0x8] sm:$0xff]  }
 0x758   : > { %1479 = vmatpush3.bf16.msra.mxu0 %v1558_v1 }
 0x759   : > { %v1052_v21 = vsel %vm414_vm0, %v1900_v19, 0.0 }
 0x75a   : > { %1053 = vadd.xlane.f32.xlu0 %v1052_v21 }
 0x7e7   : > { %v1054_v22 = vpop.xlane.xlu0 %1053 }
 0x7e8   : > { %v1055_v23 = vmul.f32 0.03125, %v1054_v22 }
 0x7ea   : > { %v1056_v24 = vsub.f32 %v1900_v19, %v1055_v23 }
 0x7ec   : > { %v1057_v25 = vmul.f32 %v1056_v24, %v1056_v24 }
 0x7ee   : > { %v1058_v26 = vsel %vm414_vm0, %v1057_v25, 0.0 }
 0x7ef   : > { %1059 = vadd.xlane.f32.xlu1 %v1058_v26 }
 0x87c   : > { %v1060_v36 = vpop.xlane.xlu1 %1059 }
 0x87d   : > { %v1061_v37 = vmul.f32 0.03125, %v1060_v36 }
 0x87f   : > { %v1062_v38 = vadd.f32 1e-05, %v1061_v37 }
 0x881   : > { %1585 = vrsqrt.f32 %v1062_v38 }
 0x88b   : > { %v1586_v39 = vpop.eup %1585 }
 0x88c   : > { %v1064_v40 = vmul.f32 %v1586_v39, %v1056_v24 }
 0x88e   : > { %v1071_v30 = vmul.f32 %v1359_v29, %v1064_v40 }
 0x890   : > { %v1078_v42 = vadd.f32 %v1360_v41, %v1071_v30 }
 0x892   : > { %v1079_v43 = vpack.c.bf16 %v1078_v42, %v1078_v42 }
 0x894   : > { %1481 = vmatmul.mubr.msk.bf16.vlgmr.msra.gmra.mrb[24].mxu0 %vm414_vm0, %v1079_v43 }
 0x967   : > { %v1140_v47 = vpop.f32.mrb[24].mxu0 }
 0x968   : > { %v1141_v48 = vadd.f32 %v1361_v46, %v1140_v47  ;;  %v1482_v49 = vpop.f32.mrb[25].mxu0 }
 0x969   : > { %v1143_v50 = vpop.f32.mrb[26].mxu0 }
 0x96a   : > { %v1146_v51 = vmax.f32 %v1141_v48, 0.0  ;;  %v1483_v52 = vpop.f32.mrb[27].mxu0 }
 0x96c   : > { %v1147_v53 = vpack.c.bf16 %v1146_v51, %v1146_v51 }
 0x96e   : > { %1501 = vmatmul.mubr.bf16.vlgmr.msra.gmra.mrb[16].mxu1 %v1147_v53 }
 0xa41   : > { %v1253_v54 = vpop.f32.mrb[16].mxu1 }
 0xa42   : > { %v1254_v55 = vadd.f32 %v1365_v9, %v1253_v54  ;;  %v1502_v56 = vpop.f32.mrb[17].mxu1 }
 0xa43   : > { %v1256_v57 = vpop.f32.mrb[18].mxu1 }
 0xa44   : > { %v1259_v58 = vadd.f32 %v1254_v55, %v1900_v19  ;;  %v1503_v59 = vpop.f32.mrb[19].mxu1 }
 0xa46   : > { %v1260_v60 = vpack.c.bf16 %v1259_v58, %v1259_v58 }
 0xa48   : > { %1262 = vst.msk [vmem:[%s404_s19] sm:$0xf] %vm1261_vm7, %v1260_v60 }
 0xa49   : > { %1600 = shalt.err (!%p1597_p3)
}
 0xa4a   : > { %s1601_s29 = scalar_lea.hbm %s1963_s0, 64  ;;  %s1605_s26 = scalar_lea.hbm %s2017_s12, 128 }
 0xa4b   : > { %p1602_p4 = scmp.ne.s32.totalorder %s1963_s0, %s1601_s29  ;;  %p1606_p9 = scmp.lt.u32.totalorder %s1963_s0, %s2017_s12 }
 0xa4c   : > { %p1607_p10 = scmp.lt.u32.totalorder %s1605_s26, %s1601_s29  ;;  %p1609_p12 = scmp.lt.u32.totalorder %s1601_s29, %s1963_s0 }
 0xa4d   : > { %p1603_p7 = pnand %p1602_p4, %p1765_p5 }
 0xa4e   : > { %p1608_p11 = por %p1607_p10, %p1606_p9 }
 0xa4f   : > { %p1604_p8 = pneg %p1603_p7 }
 0xa50   : > { %p1610_p13 = por %p1609_p12, %p1608_p11 }
 0xa52   : > { %p1611_p0 = pnand %p1610_p13, %p1604_p8 }
 0xa54   : > { %1614 = shalt.err (!%p1611_p0)
}
 0xa55   : > { %1504 = dma.vmem_to_hbm [thread:$0]  (%p1765_p5), %s1965_s20, 64, %s1963_s0, %s1264_s16  }
 0xa56 PF: > { %p1510_p1 = scmp.ge.s32.totalorder %s1649_s24, 2  ;;  %s1289_s1 = sand.u32 1, %s1637_s21  }
 0xa57   : > { %s1290_s25 = scalar_lea.sflag [#allocation3], %s1289_s1 }
 0xa58   : > { %p1507_p2 = pnand %p1510_p1, %p1769_p6 }
 0xa5a   : > { %1632 = dma.done.wait (!%p1507_p2), %s1290_s25, 64  }
 0xa5b   : > { %1634 = vsyncadd (!%p1507_p2), %s1290_s25, 4294967232  ;;  %p22_p3 = scmp.ge.s32.totalorder %s1752_s27, 4   ;;  %s2024_s21 = smov %s1641_s22 }
 0xa5c   : > { %s2025_s22 = smov %s1645_s23  ;;  %s2026_s23 = smov %s1763_s30 }
 0xa5d   : > { %s2027_s24 = smov %s1752_s27  ;;  %24 = sbr.rel (!%p22_p3) target bundleno = 6 (0x6), region = 103 }
 0xa64   :  { %1295 = vsyncpa [#allocation3], 1 }
 0xa65   :  { %1297 = vsyncpa [#allocation3 + $0x1], 1 }

</bundles_post_ra>
